<compile_context>
chip_gen: v6e
topology: v6e:2x2x1
jax: 0.10.0
libtpu: 0.0.40
codegen_flags: <defaults>
</compile_context>

<pallas_src>
import functools

import jax
import jax.numpy as jnp
import numpy as np
from jax.experimental import pallas as pl
from jax.experimental.pallas import tpu as pltpu


def _contrastive_kernel(o1_ref, o2_ref, label_ref, loss_ref, acc_ref, *,
                        margin, batch, block_rows, needs_mask):
    i = pl.program_id(0)

    @pl.when(i == 0)
    def _():
        acc_ref[...] = jnp.zeros_like(acc_ref)

    # Per-tile squared-diff partial sum. Inputs may be bf16; accumulate in f32.
    d = o1_ref[...].astype(jnp.float32) - o2_ref[...].astype(jnp.float32)
    row_sums = jnp.sum(d * d, axis=-1, keepdims=True)            # lane reduce -> (tb, 1)
    if needs_mask:
        rows = jax.lax.broadcasted_iota(jnp.int32, row_sums.shape, 0)
        valid = (i * block_rows + rows) < batch
        row_sums = jnp.where(valid, row_sums, 0.0)                # zero the padded tail rows
    acc_ref[...] += jnp.sum(row_sums, axis=0, keepdims=True)      # (1, 1) accumulator

    @pl.when(i == pl.num_programs(0) - 1)
    def _():
        ssq = acc_ref[...]                                        # (1, 1)
        norm = jnp.sqrt(ssq)                                      # Frobenius norm of whole diff
        gap = margin - jnp.sqrt(norm)                             # sqrt(norm), per reference code
        hinge = jnp.maximum(0.0, gap) ** 2
        # sum over batch of (1-label)*norm + label*hinge
        #   == (B - sum(label)) * norm + sum(label) * hinge   (norm/hinge are scalars)
        lab_sum = jnp.sum(label_ref[...].astype(jnp.float32), axis=-1, keepdims=True)  # (1, 1)
        n = jnp.float32(batch)
        loss_ref[...] = (n - lab_sum) * norm + lab_sum * hinge


def _auto_block_rows(batch, feat, itemsize):
    # Target ~8 MiB per input block: 2 inputs x 2 pipeline buffers ~= 32 MiB,
    # which fits v7x's 64 MiB physical VMEM with headroom (v5e/v6e trivially).
    target_bytes = 8 * 1024 * 1024
    tb = target_bytes // max(1, feat * itemsize)
    tb = int(min(tb, batch))
    if tb >= batch:
        return batch
    return max(8, (tb // 8) * 8)


def contrastive_loss(output1, output2, label, margin=2.0, block_rows=None):
    """output1, output2: [B, D] (f32 or bf16); label: [B, 1] (or [B]) float. Returns scalar f32."""
    assert output1.ndim == 2 and output1.shape == output2.shape
    B, D = output1.shape
    label2d = jnp.reshape(label, (1, B)).astype(jnp.float32)      # lane-dense layout

    itemsize = jnp.dtype(output1.dtype).itemsize
    tb = _auto_block_rows(B, D, itemsize) if block_rows is None else int(block_rows)
    if tb >= B or tb % 8 != 0:
        tb = B                       # single full-array block (satisfies (8,128)-or-full rule)
    num_blocks = pl.cdiv(B, tb)
    needs_mask = (B % tb) != 0

    kernel = functools.partial(
        _contrastive_kernel,
        margin=float(margin), batch=B, block_rows=tb, needs_mask=needs_mask)

    out = pl.pallas_call(
        kernel,
        out_shape=jax.ShapeDtypeStruct((1, 1), jnp.float32),
        grid_spec=pltpu.PrefetchScalarGridSpec(
            num_scalar_prefetch=0,
            grid=(num_blocks,),
            in_specs=[
                pl.BlockSpec((tb, D), lambda i: (i, 0)),          # output1 row tile
                pl.BlockSpec((tb, D), lambda i: (i, 0)),          # output2 row tile
                pl.BlockSpec((1, B), lambda i: (0, 0)),           # label: resident, read once
            ],
            out_specs=pl.BlockSpec((1, 1), lambda i: (0, 0)),
            scratch_shapes=[pltpu.VMEM((1, 1), jnp.float32)],     # ssq accumulator
        ),
        compiler_params=pltpu.CompilerParams(
            dimension_semantics=("arbitrary",),                   # reduction axis (carried acc)
            vmem_limit_bytes=48 * 1024 * 1024,
        ),
    )(output1, output2, label2d)
    return out[0, 0]


def _reference(output1, output2, label, margin=2.0):
    d = output1.astype(jnp.float32) - output2.astype(jnp.float32)
    norm = jnp.sqrt(jnp.sum(d * d))
    hinge = jnp.maximum(0.0, margin - jnp.sqrt(norm)) ** 2
    return jnp.sum((1.0 - label.astype(jnp.float32)) * norm + label.astype(jnp.float32) * hinge)


if __name__ == "__main__":
    key = jax.random.PRNGKey(0)
    k1, k2, k3 = jax.random.split(key, 3)

    # Small siamese embedding batch consistent with the module's usage.
    B, D = 2, 32
    o1 = jax.random.normal(k1, (B, D), dtype=jnp.float32)
    o2 = jax.random.normal(k2, (B, D), dtype=jnp.float32)
    lab = jax.random.bernoulli(k3, 0.5, (B, 1)).astype(jnp.float32)

    loss = jax.block_until_ready(contrastive_loss(o1, o2, lab, margin=2.0))
    ref = _reference(o1, o2, lab, margin=2.0)
    np.testing.assert_allclose(np.asarray(loss), np.asarray(ref), rtol=1e-5, atol=1e-5)

    # Exercise the streamed multi-block path, including a masked partial tail block.
    kb1, kb2, kb3 = jax.random.split(jax.random.PRNGKey(1), 3)
    B2, D2 = 40, 256
    p1 = jax.random.normal(kb1, (B2, D2), dtype=jnp.float32)
    p2 = jax.random.normal(kb2, (B2, D2), dtype=jnp.float32)
    lab2 = jax.random.bernoulli(kb3, 0.5, (B2, 1)).astype(jnp.float32)
    loss2 = jax.block_until_ready(contrastive_loss(p1, p2, lab2, margin=2.0, block_rows=16))
    ref2 = _reference(p1, p2, lab2, margin=2.0)
    np.testing.assert_allclose(np.asarray(loss2), np.asarray(ref2), rtol=1e-4, atol=1e-4)

    # bf16 inputs (halved HBM traffic); kernel accumulates in f32.
    b1 = p1.astype(jnp.bfloat16)
    b2 = p2.astype(jnp.bfloat16)
    loss3 = jax.block_until_ready(contrastive_loss(b1, b2, lab2, margin=2.0, block_rows=16))
    ref3 = _reference(b1, b2, lab2, margin=2.0)
    np.testing.assert_allclose(np.asarray(loss3), np.asarray(ref3), rtol=1e-4, atol=1e-4)

    print("KERNEL_OK")
</pallas_src>

<mosaic_0001>
module attributes {stable_mosaic.version = 11 : i64} {
  func.func @_contrastive_kernel(%arg0: i32, %arg1: memref<2x32xf32, #tpu.memory_space<vmem>>, %arg2: memref<2x32xf32, #tpu.memory_space<vmem>>, %arg3: memref<1x2xf32, #tpu.memory_space<vmem>>, %arg4: memref<1x1xf32, #tpu.memory_space<vmem>>, %arg5: memref<1x1xf32, #tpu.memory_space<vmem>>) attributes {dimension_semantics = [#tpu.dimension_semantics<arbitrary>], iteration_bounds = array<i64: 1>, scalar_prefetch = 0 : i64, scratch_operands = 1 : i64, tpu.core_type = #tpu.core_type<tc>, window_params = [{transform_indices = @transform_0, window_bounds = array<i64: 2, 32>}, {transform_indices = @transform_1, window_bounds = array<i64: 2, 32>}, {pipeline_mode = #tpu.pipeline_mode<synchronous>, transform_indices = @transform_2, window_bounds = array<i64: 1, 2>}, {pipeline_mode = #tpu.pipeline_mode<synchronous>, transform_indices = @transform_3, window_bounds = array<i64: 1, 1>}]} {
    %c0_i32 = arith.constant 0 : i32
    %0 = arith.cmpi eq, %arg0, %c0_i32 : i32
    %1 = arith.extui %0 : i1 to i32
    %c0_i32_0 = arith.constant 0 : i32
    %2 = arith.cmpi ne, %1, %c0_i32_0 : i32
    scf.if %2 {
      %cst_11 = arith.constant 0.000000e+00 : f32
      %17 = vector.broadcast %cst_11 : f32 to vector<1x1xf32>
      %c0_12 = arith.constant 0 : index
      %c0_13 = arith.constant 0 : index
      %18 = vector.load %arg5[%c0_12, %c0_13] : memref<1x1xf32, #tpu.memory_space<vmem>>, vector<1x1xf32>
      tpu.vector_store %arg5[%c0_12, %c0_13], %17 {strides = array<i32>} : memref<1x1xf32, #tpu.memory_space<vmem>>, vector<1x1xf32>,
    } else {
    }
    %c0 = arith.constant 0 : index
    %c0_1 = arith.constant 0 : index
    %3 = vector.load %arg1[%c0, %c0_1] : memref<2x32xf32, #tpu.memory_space<vmem>>, vector<2x32xf32>
    %c0_2 = arith.constant 0 : index
    %c0_3 = arith.constant 0 : index
    %4 = vector.load %arg2[%c0_2, %c0_3] : memref<2x32xf32, #tpu.memory_space<vmem>>, vector<2x32xf32>
    %5 = arith.subf %3, %4 : vector<2x32xf32>
    %6 = arith.mulf %5, %5 : vector<2x32xf32>
    %cst = arith.constant dense<0.000000e+00> : vector<2xf32>
    %7 = vector.multi_reduction <add>, %6, %cst [1] : vector<2x32xf32> to vector<2xf32>
    %8 = vector.shape_cast %7 : vector<2xf32> to vector<2x1xf32>
    %c0_4 = arith.constant 0 : index
    %c0_5 = arith.constant 0 : index
    %9 = vector.load %arg5[%c0_4, %c0_5] : memref<1x1xf32, #tpu.memory_space<vmem>>, vector<1x1xf32>
    %cst_6 = arith.constant dense<0.000000e+00> : vector<1xf32>
    %10 = vector.multi_reduction <add>, %8, %cst_6 [0] : vector<2x1xf32> to vector<1xf32>
    %11 = vector.shape_cast %10 : vector<1xf32> to vector<1x1xf32>
    %12 = arith.addf %9, %11 : vector<1x1xf32>
    %c0_7 = arith.constant 0 : index
    %c0_8 = arith.constant 0 : index
    %13 = vector.load %arg5[%c0_7, %c0_8] : memref<1x1xf32, #tpu.memory_space<vmem>>, vector<1x1xf32>
    tpu.vector_store %arg5[%c0_7, %c0_8], %12 {strides = array<i32>} : memref<1x1xf32, #tpu.memory_space<vmem>>, vector<1x1xf32>,
    %c0_i32_9 = arith.constant 0 : i32
    %14 = arith.cmpi eq, %arg0, %c0_i32_9 : i32
    %15 = arith.extui %14 : i1 to i32
    %c0_i32_10 = arith.constant 0 : i32
    %16 = arith.cmpi ne, %15, %c0_i32_10 : i32
    scf.if %16 {
      %c0_11 = arith.constant 0 : index
      %c0_12 = arith.constant 0 : index
      %17 = vector.load %arg5[%c0_11, %c0_12] : memref<1x1xf32, #tpu.memory_space<vmem>>, vector<1x1xf32>
      %18 = math.sqrt %17 : vector<1x1xf32>
      %19 = math.sqrt %18 : vector<1x1xf32>
      %cst_13 = arith.constant 2.000000e+00 : f32
      %20 = vector.broadcast %cst_13 : f32 to vector<1x1xf32>
      %21 = arith.subf %20, %19 : vector<1x1xf32>
      %cst_14 = arith.constant 0.000000e+00 : f32
      %22 = vector.broadcast %cst_14 : f32 to vector<1x1xf32>
      %23 = arith.maximumf %22, %21 : vector<1x1xf32>
      %24 = arith.mulf %23, %23 : vector<1x1xf32>
      %c0_15 = arith.constant 0 : index
      %c0_16 = arith.constant 0 : index
      %25 = vector.load %arg3[%c0_15, %c0_16] : memref<1x2xf32, #tpu.memory_space<vmem>>, vector<1x2xf32>
      %cst_17 = arith.constant dense<0.000000e+00> : vector<1xf32>
      %26 = vector.multi_reduction <add>, %25, %cst_17 [1] : vector<1x2xf32> to vector<1xf32>
      %27 = vector.shape_cast %26 : vector<1xf32> to vector<1x1xf32>
      %cst_18 = arith.constant 2.000000e+00 : f32
      %28 = vector.broadcast %cst_18 : f32 to vector<1x1xf32>
      %29 = arith.subf %28, %27 : vector<1x1xf32>
      %30 = arith.mulf %29, %18 : vector<1x1xf32>
      %31 = arith.mulf %27, %24 : vector<1x1xf32>
      %32 = arith.addf %30, %31 : vector<1x1xf32>
      %c0_19 = arith.constant 0 : index
      %c0_20 = arith.constant 0 : index
      %33 = vector.load %arg4[%c0_19, %c0_20] : memref<1x1xf32, #tpu.memory_space<vmem>>, vector<1x1xf32>
      tpu.vector_store %arg4[%c0_19, %c0_20], %32 {strides = array<i32>} : memref<1x1xf32, #tpu.memory_space<vmem>>, vector<1x1xf32>,
    } else {
    }
    return
  }
  func.func @transform_0(%arg0: i32) -> (i32, i32) {
    %c0_i32 = arith.constant 0 : i32
    %c0_i32_0 = arith.constant 0 : i32
    return %arg0, %c0_i32 : i32, i32
  }
  func.func @transform_1(%arg0: i32) -> (i32, i32) {
    %c0_i32 = arith.constant 0 : i32
    %c0_i32_0 = arith.constant 0 : i32
    return %arg0, %c0_i32 : i32, i32
  }
  func.func @transform_2(%arg0: i32) -> (i32, i32) {
    %c0_i32 = arith.constant 0 : i32
    %c0_i32_0 = arith.constant 0 : i32
    %c0_i32_1 = arith.constant 0 : i32
    return %c0_i32, %c0_i32_0 : i32, i32
  }
  func.func @transform_3(%arg0: i32) -> (i32, i32) {
    %c0_i32 = arith.constant 0 : i32
    %c0_i32_0 = arith.constant 0 : i32
    %c0_i32_1 = arith.constant 0 : i32
    return %c0_i32, %c0_i32_0 : i32, i32
  }
}

</mosaic_0001>

<bundles_post_ra>
// kernel: tpu_custom_call.1
= control target key start
LH: loop header
LB: loop body
LE: loop exit
PB: predicated region body
PF: predicated region fallthrough
CT: control target
= control target key end

     0   :  { %8 = vsyncpa [#allocation4], 0  ;;  %s225_s0 = inlined_call_operand.hbm [shape: f32[2,32], index: 0, kind: input, shape index: {}]   ;;  %s226_s1 = inlined_call_operand.hbm [shape: f32[2,32], index: 1, kind: input, shape index: {}]   ;;  %s227_s2 = inlined_call_operand.vmem [shape: f32[1,2], index: 2, kind: input, shape index: {}]   ;;  %s228_s3 = inlined_call_operand.hbm [shape: f32[1,1], index: 3, kind: output, shape index: {}]  }
   0x1   :  { %9 = vsyncpa [#allocation7], 0 }
   0x2   :  { %10 = vsyncpa [#allocation5], 0  ;;  %s186_s12 = smov [#allocation3]   ;;  %s187_s14 = smov [#allocation6]  }
   0x3   :  { %s17_s13 = sshll.u32 %s186_s12, 4  ;;  %s27_s15 = sshll.u32 %s187_s14, 4  ;;  %s18_s13 = int_to_ptr.vmem [resolvable:$true] %s17_s13  ;;  %s28_s15 = int_to_ptr.vmem [resolvable:$true] %s27_s15 }
   0x4   :  { %s128_s16 = scalar_lea.vmem %s18_s13, 32  ;;  %p133_p1 = scmp.lt.s32.totalorder %s18_s13, %s18_s13 }
   0x5   :  { %p129_p0 = scmp.ne.s32.totalorder %s18_s13, %s128_s16  ;;  %p134_p2 = scmp.lt.s32.totalorder %s128_s16, %s128_s16 }
   0x7   :  { %p135_p3 = por %p134_p2, %p133_p1 }
   0x9   :  { %p136_p4 = pnand %p135_p3, %p129_p0 }
   0xb   :  { %139 = shalt.err (!%p136_p4)
}
   0xc   :  { %20 = dma.hbm_to_vmem [thread:$0]  %s225_s0, 32, %s18_s13, [#allocation4]  }
   0xd   :  { %s148_s19 = scalar_lea.vmem %s28_s15, 32  ;;  %p153_p6 = scmp.lt.s32.totalorder %s28_s15, %s28_s15 }
   0xe   :  { %p149_p5 = scmp.ne.s32.totalorder %s28_s15, %s148_s19  ;;  %p154_p7 = scmp.lt.s32.totalorder %s148_s19, %s148_s19 }
  0x10   :  { %p155_p8 = por %p154_p7, %p153_p6 }
  0x12   :  { %p156_p9 = pnand %p155_p8, %p149_p5 }
  0x14   :  { %159 = shalt.err (!%p156_p9)
}
  0x15   :  { %30 = dma.hbm_to_vmem [thread:$0]  %s226_s1, 32, %s28_s15, [#allocation7]  }
  0x16   :  { %180 = dma.done.wait [#allocation4], 32  }
  0x17   :  { %181 = vsyncadd [#allocation4], 4294967264 }
  0x18   :  { %182 = dma.done.wait [#allocation7], 32  }
  0x19   :  { %183 = vsyncadd [#allocation7], 4294967264  ;;  %v45_v0 = vld [vmem:[#allocation3] sm:$0x3]  ;;  %v46_v1 = vld [vmem:[#allocation6] sm:$0x3] }
  0x1a   :  { %v47_v2 = vsub.f32 %v45_v0, %v46_v1  ;;  %vm49_vm0 = vcmask 254976   ;;  %v86_v4 = vld [vmem:[%s227_s2] sm:$0x1]  ;;  %vm87_vm1 = vcmask 8192   ;;  %vm43_vm2 = vcmask 0   ;;  %s189_s1 = smov [#allocation8]  }
  0x1b   :  { %v88_v6 = vsel %vm87_vm1, %v86_v4, 0.0  ;;  %v188_v7 = vmov 0.0   ;;  %vm54_vm3 = vcmask 1041408   ;;  %s102_s2 = sshll.u32 %s189_s1, 4  ;;  %s103_s2 = int_to_ptr.vmem [resolvable:$true] %s102_s2 }
  0x1c   :  { %v48_v3 = vmul.f32 %v47_v2, %v47_v2  ;;  %44 = vst.msk [vmem:[#allocation2] sm:$0x1] %vm43_vm2, %v188_v7  ;;  %s160_s23 = scalar_lea.vmem %s103_s2, 16  ;;  %s164_s24 = scalar_lea.vmem %s103_s2, 32 }
  0x1d   :  { %p161_p10 = scmp.ne.s32.totalorder %s103_s2, %s160_s23  ;;  %p165_p11 = scmp.lt.s32.totalorder %s103_s2, %s103_s2 }
  0x1e   :  { %v50_v5 = vsel %vm49_vm0, %v48_v3, 0.0  ;;  %p166_p12 = scmp.lt.s32.totalorder %s164_s24, %s160_s23 }
  0x1f   :  { %51 = vadd.xlane.f32.xlu0 %v50_v5 }
  0x20   :  { %p167_p13 = por %p166_p12, %p165_p11 }
  0x22   :  { %p168_p0 = pnand %p167_p13, %p161_p10 }
  0x23   :  { %89 = vadd.xlane.f32.xlu0 %v88_v6  ;;  %v53_v15 = vld [vmem:[#allocation2] sm:$0x1] }
  0xa8   :  { %v52_v8 = vpop.xlane.xlu0 %51 }
  0xa9   :  { %v55_v9 = vsel %vm54_vm3, %v52_v8, 0.0 }
  0xaa   :  { %v56_v10 = vrot.slane %v55_v9, 4 }
  0xac   :  { %v57_v11 = vadd.f32 %v56_v10, %v55_v9  ;;  %v90_v28 = vpop.xlane.xlu0 %89 }
  0xad   :  { %v91_v32 = vsub.f32 2.0, %v90_v28 }
  0xae   :  { %v58_v12 = vrot.slane %v57_v11, 2 }
  0xb0   :  { %v59_v13 = vadd.f32 %v58_v12, %v57_v11 }
  0xb2   :  { %v60_v14 = vrot.slane %v59_v13, 1 }
  0xb4   :  { %v61_v16 = vadd.f32 %v60_v14, %v59_v13 }
  0xb6   :  { %v62_v17 = vadd.f32 %v61_v16, %v53_v15 }
  0xb8   :  { %64 = vst.msk [vmem:[#allocation2] sm:$0x1] %vm43_vm2, %v62_v17 }
  0xbf   :  { %v68_v18 = vld [vmem:[#allocation2] sm:$0x1] }
  0xc0   :  { %116 = vrsqrt.f32 %v68_v18  ;;  %vm71_vm4 = vcmp.eq.f32.partialorder %v68_v18, inf  ;;  %v74_v21 = vand.u32 2147483648, %v68_v18  ;;  %vm73_vm5 = vcmp.eq.f32.partialorder %v68_v18, 0.0 }
  0xcd   :  { %v117_v19 = vpop.eup %116 }
  0xce   :  { %v70_v20 = vmul.f32 %v117_v19, %v68_v18 }
  0xd0   :  { %v72_v22 = vsel %vm71_vm4, %v68_v18, %v70_v20 }
  0xd1   :  { %v75_v23 = vsel %vm73_vm5, %v74_v21, %v72_v22 }
  0xd2   :  { %118 = vrsqrt.f32 %v75_v23  ;;  %vm78_vm6 = vcmp.eq.f32.partialorder %v75_v23, inf  ;;  %v81_v26 = vand.u32 2147483648, %v75_v23  ;;  %vm80_vm7 = vcmp.eq.f32.partialorder %v75_v23, 0.0 }
  0xd3   :  { %v92_v34 = vmul.f32 %v91_v32, %v75_v23 }
  0xdf   :  { %v119_v24 = vpop.eup %118 }
  0xe0   :  { %v77_v25 = vmul.f32 %v119_v24, %v75_v23 }
  0xe2   :  { %v79_v27 = vsel %vm78_vm6, %v75_v23, %v77_v25 }
  0xe3   :  { %v82_v29 = vsel %vm80_vm7, %v81_v26, %v79_v27 }
  0xe4   :  { %v83_v30 = vsub.f32 2.0, %v82_v29 }
  0xe6   :  { %v84_v31 = vmax.f32 %v83_v30, 0.0 }
  0xe8   :  { %v85_v33 = vmul.f32 %v84_v31, %v84_v31 }
  0xea   :  { %v93_v35 = vmul.f32 %v90_v28, %v85_v33 }
  0xec   :  { %v94_v36 = vadd.f32 %v93_v35, %v92_v34 }
  0xee   :  { %95 = vst.msk [vmem:[#allocation8] sm:$0x1] %vm43_vm2, %v94_v36 }
  0xef   :  { %171 = shalt.err (!%p168_p0)
}
  0xf0   :  { %105 = dma.vmem_to_hbm [thread:$0]  %s103_s2, 16, %s228_s3, [#allocation5]  }
  0xf1   :  { %184 = dma.done.wait [#allocation5], 16  }
  0xf2   :  { %185 = vsyncadd [#allocation5], 4294967280 }
  0xf3   :  { %109 = vsyncpa [#allocation4], 1 }
  0xf4   :  { %110 = vsyncpa [#allocation7], 1 }
  0xf5   :  { %111 = vsyncpa [#allocation5], 1 }

</bundles_post_ra>
